<compile_context>
chip_gen: v7x
topology: tpu7x:2x2x1
jax: 0.10.0
libtpu: 0.0.40
codegen_flags: <defaults>
</compile_context>

<pallas_src>
import jax
import jax.numpy as jnp
from jax import lax
from jax.experimental import pallas as pl
from jax.experimental.pallas import tpu as pltpu


# Flash-kernel tiles (decoupled; both must divide n_pad).
_TM_FLASH = 512                   # row block of the streaming pairwise kernel
_TN_FLASH = 512                   # col block (K depth of the em@Wh dot)
_N_PAD_UNIT = 512                 # node-count padding granularity
_TILE_F = 128                     # feature padding unit (lane-dense)
_VMEM_LIMIT = 32 * 1024 * 1024    # safe scoped-VMEM budget on v5e/v6e/v7x


def _round_up(n, m):
    return ((n + m - 1) // m) * m


def _choose_tile(total, desired, minimum):
    """Largest power-of-two multiple of `minimum` <= desired that divides `total`."""
    t = desired
    while t > minimum and total % t:
        t //= 2
    return t


def _pad2d(x, rows, cols):
    r, c = x.shape
    if r == rows and c == cols:
        return x
    return jnp.pad(x, ((0, rows - r), (0, cols - c)))


# --------------------------- generic tiled matmul (Wh = X @ W) ---------------------------

def _matmul_kernel(a_ref, b_ref, o_ref):
    @pl.when(pl.program_id(2) == 0)
    def _init():
        o_ref[...] = jnp.zeros_like(o_ref)

    # Accumulate straight into the (f32, k-resident) output block: no scratch copy.
    o_ref[...] += jnp.dot(a_ref[...], b_ref[...], preferred_element_type=jnp.float32)


def _tiled_matmul(a, b, *, tm, tn, tk):
    m, k = a.shape
    _, n = b.shape
    assert m % tm == 0 and n % tn == 0 and k % tk == 0
    cost = pl.CostEstimate(
        flops=int(2 * m * n * k),
        transcendentals=0,
        bytes_accessed=int(m * k * a.dtype.itemsize + k * n * b.dtype.itemsize + m * n * 4),
    )
    return pl.pallas_call(
        _matmul_kernel,
        out_shape=jax.ShapeDtypeStruct((m, n), jnp.float32),
        grid_spec=pltpu.PrefetchScalarGridSpec(
            num_scalar_prefetch=0,
            grid=(m // tm, n // tn, k // tk),
            in_specs=[
                pl.BlockSpec((tm, tk), lambda i, j, l: (i, l)),
                pl.BlockSpec((tk, tn), lambda i, j, l: (l, j)),
            ],
            out_specs=pl.BlockSpec((tm, tn), lambda i, j, l: (i, j)),
        ),
        compiler_params=pltpu.CompilerParams(
            dimension_semantics=("parallel", "parallel", "arbitrary"),
            vmem_limit_bytes=_VMEM_LIMIT,
        ),
        cost_estimate=cost,
    )(a, b)


# ---------------- fused low_X = adj @ Wh  (+ squared row norms of low_X) ----------------

def _adjmm_rownorm_kernel(adj_ref, wh_ref, o_ref, rn_ref):
    @pl.when(pl.program_id(1) == 0)
    def _init():
        o_ref[...] = jnp.zeros_like(o_ref)

    # Binary adjacency travels as bf16 (exact); promoted on the fly for the MXU.
    # TODO(synk): switch to a native mixed bf16 x f32 MXU path once verified in Mosaic.
    o_ref[...] += jnp.dot(adj_ref[...], wh_ref[...], preferred_element_type=jnp.float32)

    @pl.when(pl.program_id(1) == pl.num_programs(1) - 1)
    def _finalize():
        acc = o_ref[...]
        # Fused squared row norms: saves a full extra HBM read of low_X in the wrapper.
        rn_ref[...] = jnp.sum(acc * acc, axis=1, keepdims=True)


def _adj_matmul_rownorm(adj_bf16, wh):
    n_pad = adj_bf16.shape[0]
    fout_pad = wh.shape[1]
    tm = _choose_tile(n_pad, 512, _N_PAD_UNIT)     # output row block
    tk = _choose_tile(n_pad, 2048, _N_PAD_UNIT)    # large K tiles: fewer, bigger adj DMAs
    cost = pl.CostEstimate(
        flops=int(2 * n_pad * n_pad * fout_pad),
        transcendentals=0,
        bytes_accessed=int(n_pad * n_pad * 2
                           + (n_pad // tm) * n_pad * fout_pad * 4
                           + n_pad * fout_pad * 4),
    )
    return pl.pallas_call(
        _adjmm_rownorm_kernel,
        out_shape=(
            jax.ShapeDtypeStruct((n_pad, fout_pad), jnp.float32),
            jax.ShapeDtypeStruct((n_pad, 1), jnp.float32),
        ),
        grid_spec=pltpu.PrefetchScalarGridSpec(
            num_scalar_prefetch=0,
            grid=(n_pad // tm, n_pad // tk),
            in_specs=[
                pl.BlockSpec((tm, tk), lambda i, k: (i, k)),
                pl.BlockSpec((tk, fout_pad), lambda i, k: (k, 0)),
            ],
            out_specs=[
                pl.BlockSpec((tm, fout_pad), lambda i, k: (i, 0)),
                pl.BlockSpec((tm, 1), lambda i, k: (i, 0)),
            ],
        ),
        compiler_params=pltpu.CompilerParams(
            dimension_semantics=("parallel", "arbitrary"),
            vmem_limit_bytes=_VMEM_LIMIT,
        ),
        cost_estimate=cost,
    )(adj_bf16, wh)


# --------------------------- flash-style gcn=True kernel ---------------------------

def _gcn_flash_kernel(a_ref, q_ref, k_ref, whf_ref, adj_ref, qn_ref, kn_ref,
                      out_ref, den_ref):
    j = pl.program_id(1)

    @pl.when(j == 0)
    def _init():
        out_ref[...] = jnp.zeros_like(out_ref)
        den_ref[...] = jnp.zeros_like(den_ref)

    q = q_ref[...]                                   # (TM, Fp)  low_X row block
    k = k_ref[...]                                   # (TN, Fp)  low_X col block

    # xxt tile with no materialized transpose: contract the feature axis on the MXU.
    qk = lax.dot_general(q, k,
                         dimension_numbers=(((1,), (1,)), ((), ())),
                         preferred_element_type=jnp.float32)          # (TM, TN)

    # Pairwise squared distances; padded columns carry +inf norm => e == 0 there.
    d = (qn_ref[...] - 2.0 * qk) + kn_ref[...]
    e = jnp.exp(-d)                                                   # EUP

    # Mask in the adjacency's native (bf16) dtype: no full-tile upcast on the VPU.
    em = jnp.where(adj_ref[...] == 0, e, 0.0)

    den_ref[...] += jnp.sum(e, axis=1, keepdims=True)    # full (unmasked) row sum
    # Unnormalized X1 accumulated straight into the j-resident output block.  whf has
    # an all-ones padded column, so its lane of this dot is the masked row sum (no
    # extra cross-lane reduce of the masked tile needed).
    out_ref[...] += jnp.dot(em, whf_ref[...], preferred_element_type=jnp.float32)

    @pl.when(j == pl.num_programs(1) - 1)
    def _finalize():
        a = a_ref[0, 0]
        inv = 1.0 / den_ref[...]        # exact reciprocal; runs once per row block
        out_ref[...] = out_ref[...] * (inv * a) + q


# --------------------------- wrapper ---------------------------

def mask_forward(X, adj, weight, a, gcn=False, le=True):
    """JAX/Pallas equivalent of Mask.forward. Returns (target, output)."""
    del le  # unused by the PyTorch forward as well
    n, fin = X.shape
    fout = weight.shape[1]

    n_pad = _round_up(n, _N_PAD_UNIT)
    fin_pad = _round_up(fin, _TILE_F)
    # +1 guarantees >= 1 zero-padded Wh column that the flash kernel repurposes as an
    # all-ones column (MXU-computed masked row sums).
    fout_pad = _round_up(fout + 1, _TILE_F)

    x_p = _pad2d(X.astype(jnp.float32), n_pad, fin_pad)
    w_p = _pad2d(weight.astype(jnp.float32), fin_pad, fout_pad)
    # Binary adjacency is exact in bf16 -> half the HBM traffic for the biggest array.
    # TODO(synk): keep adj in f32 if weighted (non-binary) adjacencies must be supported.
    adj_p = _pad2d(adj, n_pad, n_pad).astype(jnp.bfloat16)

    wh = _tiled_matmul(
        x_p, w_p,
        tm=_choose_tile(n_pad, 512, _N_PAD_UNIT),
        tn=_choose_tile(fout_pad, 512, _TILE_F),
        tk=_choose_tile(fin_pad, 512, _TILE_F))                       # (n_pad, fout_pad)

    # low_X = adj @ Wh fused with the squared-row-norm output (used by the gcn branch).
    low_x, rn = _adj_matmul_rownorm(adj_p, wh)          # (n_pad, fout_pad), (n_pad, 1)

    if not gcn:
        # PyTorch returns python int 0 for the target in this branch.
        return jnp.zeros((), jnp.float32), low_x[:n, :fout]

    # Row norms both as an (n_pad,1) column and a (1,n_pad) row (no in-kernel transpose).
    # Padded columns -> +inf norm -> exp(-d) == 0 -> they never contribute.
    row_norm = rn
    col_norm = jnp.where(jnp.arange(n_pad) < n, rn[:, 0], jnp.inf)[None, :].astype(jnp.float32)

    # Ones column in the (otherwise zero) padded region of Wh -> masked row sums for free.
    wh_flash = wh.at[:, fout].set(1.0)

    a_smem = jnp.reshape(a, (1, 1)).astype(jnp.float32)

    gi = n_pad // _TM_FLASH
    gj = n_pad // _TN_FLASH
    cost = pl.CostEstimate(
        flops=int(4 * n_pad * n_pad * fout_pad),
        transcendentals=int(n_pad * n_pad),
        bytes_accessed=int(n_pad * n_pad * 2
                           + gi * 2 * n_pad * fout_pad * 4
                           + 2 * n_pad * fout_pad * 4),
    )

    out_p = pl.pallas_call(
        _gcn_flash_kernel,
        out_shape=jax.ShapeDtypeStruct((n_pad, fout_pad), jnp.float32),
        grid_spec=pltpu.PrefetchScalarGridSpec(
            num_scalar_prefetch=0,
            grid=(gi, gj),
            in_specs=[
                pl.BlockSpec(memory_space=pltpu.MemorySpace.SMEM),           # a (scalar)
                pl.BlockSpec((_TM_FLASH, fout_pad), lambda i, j: (i, 0)),    # low_X row block
                pl.BlockSpec((_TN_FLASH, fout_pad), lambda i, j: (j, 0)),    # low_X col block
                pl.BlockSpec((_TN_FLASH, fout_pad), lambda i, j: (j, 0)),    # Wh cols (+ ones col)
                pl.BlockSpec((_TM_FLASH, _TN_FLASH), lambda i, j: (i, j)),   # adj tile (bf16)
                pl.BlockSpec((_TM_FLASH, 1), lambda i, j: (i, 0)),           # row norms
                pl.BlockSpec((1, _TN_FLASH), lambda i, j: (0, j)),           # col norms (+inf pad)
            ],
            out_specs=pl.BlockSpec((_TM_FLASH, fout_pad), lambda i, j: (i, 0)),
            scratch_shapes=[
                pltpu.VMEM((_TM_FLASH, 1), jnp.float32),        # den (full row sums)
            ],
        ),
        compiler_params=pltpu.CompilerParams(
            dimension_semantics=("parallel", "arbitrary"),
            vmem_limit_bytes=_VMEM_LIMIT,
        ),
        cost_estimate=cost,
    )(a_smem, low_x, low_x, wh_flash, adj_p, row_norm, col_norm)

    # Column `fout` of the padded output holds a * (masked rowsum / full rowsum) per row
    # (low_X is identically zero there), so target is just its sum over the real rows.
    target = jnp.reshape(jnp.sum(out_p[:n, fout]), (1,))   # target has shape (1,) like torch
    output = out_p[:n, :fout]
    return target, output


# --------------------------- reference (pure JAX) ---------------------------

def mask_forward_ref(X, adj, weight, a, gcn=False):
    wh = X @ weight
    low_x = adj @ wh
    if not gcn:
        return jnp.zeros((), jnp.float32), low_x
    sum_row = jnp.sum(low_x ** 2, axis=1)
    xxt = low_x @ low_x.T
    pij = sum_row[None, :] + sum_row[:, None] - 2.0 * xxt
    pij = jnp.exp(0.0 - pij)
    pij = pij / jnp.sum(pij, axis=1, keepdims=True)
    pij_mask = pij * (adj == 0.0)
    target = a * jnp.sum(pij_mask)
    x1 = jnp.maximum(pij_mask, 0.0) @ wh
    return target, x1 * a + low_x


# --------------------------- demo ---------------------------

if __name__ == "__main__":
    N = 700          # pads to 1024 -> 2x2 flash grid (512 tiles), 2 row blocks for megacore
    IN_F = 48        # in_features (pads to 128)
    OUT_F = 40       # out_features (pads to 128, incl. the reserved ones column)

    key = jax.random.PRNGKey(0)
    kx, kadj, kw = jax.random.split(key, 3)

    # Small-magnitude features so pairwise distances are O(1) and the masked
    # attention path is numerically non-trivial.
    X = 0.005 * jax.random.normal(kx, (N, IN_F), dtype=jnp.float32)

    # Deterministic binary adjacency with self-loops (so `adj == 0` mask is nontrivial).
    adj = (jax.random.uniform(kadj, (N, N)) > 0.6).astype(jnp.float32)
    adj = jnp.maximum(adj, jnp.eye(N, dtype=jnp.float32))

    # xavier_uniform-style init for `weight` (the module's `A` param is unused in forward).
    bound = (6.0 / (IN_F + OUT_F)) ** 0.5
    weight = jax.random.uniform(kw, (IN_F, OUT_F), minval=-bound, maxval=bound,
                                dtype=jnp.float32)

    # Module init sets a = [0.0] which trivializes the gcn branch; use a nonzero value.
    a = jnp.array([0.5], dtype=jnp.float32)

    # gcn=False branch
    t0, out0 = mask_forward(X, adj, weight, a, gcn=False)
    jax.block_until_ready(out0)
    _, out0_ref = mask_forward_ref(X, adj, weight, a[0], gcn=False)
    assert jnp.allclose(out0, out0_ref, rtol=2e-3, atol=2e-3)

    # gcn=True branch (hot path)
    t1, out1 = mask_forward(X, adj, weight, a, gcn=True)
    jax.block_until_ready((t1, out1))
    t1_ref, out1_ref = mask_forward_ref(X, adj, weight, a[0], gcn=True)
    assert jnp.allclose(t1[0], t1_ref, rtol=2e-3, atol=2e-3)
    assert jnp.allclose(out1, out1_ref, rtol=2e-3, atol=2e-3)

    print("KERNEL_OK")
</pallas_src>

<mosaic_0001>
module attributes {stable_mosaic.version = 11 : i64} {
  func.func @_matmul_kernel(%arg0: i32, %arg1: i32, %arg2: i32, %arg3: memref<512x128xf32, #tpu.memory_space<vmem>>, %arg4: memref<128x128xf32, #tpu.memory_space<vmem>>, %arg5: memref<512x128xf32, #tpu.memory_space<vmem>>) attributes {dimension_semantics = [#tpu.dimension_semantics<parallel>, #tpu.dimension_semantics<parallel>, #tpu.dimension_semantics<arbitrary>], iteration_bounds = array<i64: 2, 1, 1>, scalar_prefetch = 0 : i64, scratch_operands = 0 : i64, tpu.core_type = #tpu.core_type<tc>, window_params = [{transform_indices = @transform_0, window_bounds = array<i64: 512, 128>}, {transform_indices = @transform_1, window_bounds = array<i64: 128, 128>}, {transform_indices = @transform_2, window_bounds = array<i64: 512, 128>}]} {
    %c0_i32 = arith.constant 0 : i32
    %0 = arith.cmpi eq, %arg2, %c0_i32 : i32
    %1 = arith.extui %0 : i1 to i32
    %c0_i32_0 = arith.constant 0 : i32
    %2 = arith.cmpi ne, %1, %c0_i32_0 : i32
    scf.if %2 {
      %cst_8 = arith.constant 0.000000e+00 : f32
      %9 = vector.broadcast %cst_8 : f32 to vector<512x128xf32>
      %c0_9 = arith.constant 0 : index
      %c0_10 = arith.constant 0 : index
      %10 = vector.load %arg5[%c0_9, %c0_10] : memref<512x128xf32, #tpu.memory_space<vmem>>, vector<512x128xf32>
      tpu.vector_store %arg5[%c0_9, %c0_10], %9 {strides = array<i32>} : memref<512x128xf32, #tpu.memory_space<vmem>>, vector<512x128xf32>,
    } else {
    }
    %c0 = arith.constant 0 : index
    %c0_1 = arith.constant 0 : index
    %3 = vector.load %arg5[%c0, %c0_1] : memref<512x128xf32, #tpu.memory_space<vmem>>, vector<512x128xf32>
    %c0_2 = arith.constant 0 : index
    %c0_3 = arith.constant 0 : index
    %4 = vector.load %arg3[%c0_2, %c0_3] : memref<512x128xf32, #tpu.memory_space<vmem>>, vector<512x128xf32>
    %c0_4 = arith.constant 0 : index
    %c0_5 = arith.constant 0 : index
    %5 = vector.load %arg4[%c0_4, %c0_5] : memref<128x128xf32, #tpu.memory_space<vmem>>, vector<128x128xf32>
    %cst = arith.constant dense<0.000000e+00> : vector<512x128xf32>
    %6 = tpu.matmul %4, %5, %cst {dimension_numbers = #tpu.dot_dimension_numbers<[1], [0], [0], [1], [0, 0, 1, 1], [], []>} : vector<512x128xf32>, vector<128x128xf32>, vector<512x128xf32> -> vector<512x128xf32>
    %7 = arith.addf %3, %6 : vector<512x128xf32>
    %c0_6 = arith.constant 0 : index
    %c0_7 = arith.constant 0 : index
    %8 = vector.load %arg5[%c0_6, %c0_7] : memref<512x128xf32, #tpu.memory_space<vmem>>, vector<512x128xf32>
    tpu.vector_store %arg5[%c0_6, %c0_7], %7 {strides = array<i32>} : memref<512x128xf32, #tpu.memory_space<vmem>>, vector<512x128xf32>,
    return
  }
  func.func @transform_0(%arg0: i32, %arg1: i32, %arg2: i32) -> (i32, i32) {
    %c0_i32 = arith.constant 0 : i32
    return %arg0, %arg2 : i32, i32
  }
  func.func @transform_1(%arg0: i32, %arg1: i32, %arg2: i32) -> (i32, i32) {
    %c0_i32 = arith.constant 0 : i32
    return %arg2, %arg1 : i32, i32
  }
  func.func @transform_2(%arg0: i32, %arg1: i32, %arg2: i32) -> (i32, i32) {
    %c0_i32 = arith.constant 0 : i32
    return %arg0, %arg1 : i32, i32
  }
}

</mosaic_0001>

<bundles_post_ra>
// kernel: tpu_custom_call.1
= control target key start
LH: loop header
LB: loop body
LE: loop exit
PB: predicated region body
PF: predicated region fallthrough
CT: control target
= control target key end

     0   :  { %7 = vsyncpa [#allocation3], 0  ;;  %s1940_s0 = inlined_call_operand.hbm [shape: f32[1024,128], index: 0, kind: input, shape index: {}]   ;;  %s1941_s1 = inlined_call_operand.hbm [shape: f32[128,128], index: 1, kind: input, shape index: {}]   ;;  %s1942_s2 = inlined_call_operand.hbm [shape: f32[1024,128], index: 2, kind: output, shape index: {}]  }
   0x1   :  { %9 = vsyncpa [#allocation3 + $0x1], 0 }
   0x2   :  { %10 = vsyncpa [#allocation6], 0 }
   0x3   :  { %11 = vsyncpa [#allocation4], 0 }
   0x4   :  { %13 = vsyncpa [#allocation4 + $0x1], 0  ;;  %s1578_s9 = smov 0   ;;  %s1580_s10 = smov 0  }
   0x5   :  { %s1582_s11 = smov 0   ;;  %s1584_s12 = smov 0  }
   0x6   :  { %s1586_s13 = smov 0   ;;  %s1588_s14 = smov 0  }
   0x7 LB: > { %s1057_s15 = sadd.s32 4294967295, %s1554_s14   ;;  %s1058_s16 = sadd.s32 4294967294, %s1554_s14   ;;  %s1554_s14 = sphi %s1588_s14, %s19_s14   ;;  %s1550_s13 = sphi %s1586_s13, %s1966_s13   ;;  %s1546_s12 = sphi %s1584_s12, %s1965_s12   ;;  %s1542_s11 = sphi %s1582_s11, %s1964_s11   ;;  %s1538_s10 = sphi %s1580_s10, %s1963_s10   ;;  %s1534_s9 = sphi %s1578_s9, %s1962_s9  }
   0x8   : > { %p60_p0 = scmp.ne.s32.totalorder %s1538_s10, %s1534_s9  ;;  %p1612_p1 = scmp.eq.s32.totalorder %s1057_s15, 0 }
   0x9   : > { %p1616_p2 = scmp.eq.s32.totalorder %s1057_s15, 1  ;;  %p120_p3 = scmp.eq.s32.totalorder %s1058_s16, 1 }
   0xa   : > { %s1947_s17 = scalar_select %p1612_p1, 1, 0 }
   0xb   : > { %s1948_s18 = scalar_select %p1616_p2, 1, 0 }
   0xc   : > { %p1622_p4 = por %p1612_p1, %p60_p0  ;;  %p1059_p5 = scmp.ge.s32.totalorder %s1554_s14, 1 }
   0xd   : > { %p1627_p6 = por %p120_p3, %p60_p0  ;;  %p127_p7 = scmp.lt.s32.totalorder %s1554_s14, 3 }
   0xe   : > { %s1949_s19 = scalar_select %p1622_p4, 1, 0 }
   0xf   : > { %s1950_s20 = scalar_select %p1627_p6, 1, 0 }
  0x10   : > { %p1632_p8 = pnand %p1059_p5, %p127_p7  ;;  %s1556_s22 = smov [#allocation5]  }
  0x11   : > { %s143_s23 = sshll.u32 %s1556_s22, 4  ;;  %s38_s25 = sadd.s32 1, %s1550_s13  ;;  %s144_s23 = int_to_ptr.vmem [resolvable:$true] %s143_s23 }
  0x12   : > { %s1951_s21 = scalar_select %p1632_p8, 1, 0 }
  0x13   : > { %p1340_p9 = pneg %p1632_p8  ;;  %s1410_s28 = scalar_lea.hbm %s1941_s1, 2048 }
  0x14   : > { %p1411_p12 = scmp.ne.s32.totalorder %s1941_s1, %s1410_s28  ;;  %p1417_p5 = scmp.lt.u32.totalorder %s1410_s28, %s1941_s1 }
  0x15   : > { %p1641_p11 = pnand %p1340_p9, %p1612_p1 }
  0x17   : > { %p1412_p13 = pneg %p1641_p11 }
  0x19   : > { %p1413_p0 = pnand %p1412_p13, %p1411_p12 }
  0x1b   : > { %p1414_p3 = pneg %p1413_p0 }
  0x1d   : > { %p1419_p7 = pnand %p1417_p5, %p1414_p3 }
  0x1f   : > { %1422 = shalt.err (!%p1419_p7)
}
  0x20   : > { %s1423_s5 = scalar_lea.vmem %s144_s23, 2048  ;;  %p1431_p1 = scmp.lt.s32.totalorder %s144_s23, %s144_s23 }
  0x21   : > { %p1424_p9 = scmp.ne.s32.totalorder %s144_s23, %s1423_s5  ;;  %p1432_p4 = scmp.lt.s32.totalorder %s1423_s5, %s1423_s5 }
  0x23   : > { %p1426_p10 = pnand %p1424_p9, %p1412_p13  ;;  %p1433_p8 = por %p1432_p4, %p1431_p1 }
  0x25   : > { %p1427_p6 = pneg %p1426_p10 }
  0x27   : > { %p1434_p2 = pnand %p1433_p8, %p1427_p6 }
  0x29   : > { %1437 = shalt.err (!%p1434_p2)
}
  0x2a   : > { %s1557_s6 = smov 128   ;;  %s1558_s7 = smov 8  }
  0x2b   : > { %1343 = dma.hbm_to_vmem [thread:$0]  (!%p1641_p11), %s1941_s1, 2048, %s144_s23, [#allocation6], %s1557_s6, %s1557_s6, %s1558_s7  }
  0x2c   : > { %p40_p1 = scmp.ge.s32.totalorder %s38_s25, 2  ;;  %s47_s16 = sadd.s32 1, %s1542_s11 }
  0x2d   : > { %p54_p2 = scmp.ne.s32.totalorder %s1542_s11, %s1538_s10  ;;  %p55_p4 = scmp.eq.s32.totalorder %s1554_s14, 0 }
  0x2e   : > { %s1968_s25 = smov (%p40_p1, %s38_s25), 0  ;;  %p1954_p8 = scmp.ne.s32.totalorder %s1948_s18, 0 }
  0x2f   : > { %p1671_p6 = por %p55_p4, %p54_p2  ;;  %s42_s26 = ssub.s32 %s1550_s13, %s1968_s25 }
  0x30   : > { %p1677_p10 = por %p1954_p8, %p54_p2  ;;  %p1353_p12 = scmp.lt.s32.totalorder %s1554_s14, 2 }
  0x31   : > { %p45_p11 = scmp.eq.s32.totalorder %s42_s26, 0  ;;  %s157_s23 = sand.u32 1, %s1542_s11  }
  0x32   : > { %s1062_s27 = sshll.u32 %s157_s23, 9  ;;  %s1074_s29 = sshll.u32 %s1550_s13, 13 }
  0x33   : > { %s1686_s28 = scalar_select %p45_p11, %s1542_s11, %s47_s16  }
  0x34   : > { %s1692_s4 = scalar_lea.hbm %s1940_s0, %s1074_s29  ;;  %s161_s18 = scalar_lea.vmem [#allocation2], %s1062_s27 }
  0x35   : > { %s169_s5 = sshll.u32 %s161_s18, 4  ;;  %p1698_p13 = pnand %p1353_p12, %p1671_p6  ;;  %s1694_s5 = int_to_ptr.vmem [resolvable:$true] %s169_s5 }
  0x36   : > { %s1702_s15 = scalar_lea.sflag [#allocation3], %s157_s23  ;;  %s1438_s16 = scalar_lea.hbm %s1692_s4, 8192 }
  0x37   : > { %p1439_p0 = scmp.ne.s32.totalorder %s1692_s4, %s1438_s16  ;;  %p1440_p3 = pneg %p1698_p13 }
  0x38   : > { %s1443_s22 = scalar_lea.hbm %s1940_s0, 16384  ;;  %p1444_p9 = scmp.lt.u32.totalorder %s1692_s4, %s1940_s0 }
  0x39   : > { %p1441_p5 = pnand %p1440_p3, %p1439_p0  ;;  %p1445_p1 = scmp.lt.u32.totalorder %s1443_s22, %s1438_s16 }
  0x3a   : > { %p1447_p4 = scmp.lt.u32.totalorder %s1438_s16, %s1692_s4 }
  0x3b   : > { %p1442_p7 = pneg %p1441_p5  ;;  %p1446_p2 = por %p1445_p1, %p1444_p9 }
  0x3d   : > { %p1448_p6 = por %p1447_p4, %p1446_p2 }
  0x3f   : > { %p1449_p8 = pnand %p1448_p6, %p1442_p7 }
  0x41   : > { %1452 = shalt.err (!%p1449_p8)
}
  0x42   : > { %s1453_s23 = scalar_lea.vmem %s1694_s5, 8192  ;;  %s1559_s3 = smov [#allocation2]  }
  0x43   : > { %p1454_p12 = scmp.ne.s32.totalorder %s1694_s5, %s1453_s23  ;;  %s1458_s18 = sshll.u32 %s1559_s3, 4  ;;  %s1459_s18 = int_to_ptr.vmem [resolvable:$false] %s1458_s18 }
  0x44   : > { %s1460_s26 = scalar_lea.vmem %s1459_s18, 16384  ;;  %p1461_p5 = scmp.lt.s32.totalorder %s1694_s5, %s1459_s18 }
  0x45   : > { %p1456_p11 = pnand %p1454_p12, %p1440_p3  ;;  %p1462_p9 = scmp.lt.s32.totalorder %s1460_s26, %s1453_s23 }
  0x47   : > { %p1457_p0 = pneg %p1456_p11  ;;  %p1463_p1 = por %p1462_p9, %p1461_p5 }
  0x49   : > { %p1464_p2 = pnand %p1463_p1, %p1457_p0 }
  0x4b   : > { %1467 = shalt.err (!%p1464_p2)
}
  0x4c   : > { %1347 = dma.hbm_to_vmem [thread:$0]  (!%p1698_p13), %s1692_s4, 8192, %s1694_s5, %s1702_s15, %s1557_s6, %s1557_s6, %s1558_s7  }
  0x4d   : > { %p1957_p3 = scmp.ne.s32.totalorder %s1951_s21, 0 }
  0x4e   : > { %s1736_s16 = sand.u32 (!%p1957_p3), 1, %s1538_s10   ;;  %p1958_p7 = scmp.ne.s32.totalorder (!%p1957_p3), %s1949_s19, 0 }
  0x4f   : > { %181 = sbr.rel (%p1957_p3) target bundleno = 413 (0x19d), region = 28  ;;  %s1066_s27 = sshll.u32 (!%p1957_p3), %s1736_s16, 9 }
  0x50   : > { %s184_s22 = scalar_lea.sflag (!%p1957_p3), [#allocation3], %s1736_s16  ;;  %s1742_s8 = scalar_lea.vmem (!%p1957_p3), [#allocation2], %s1066_s27 }
  0x56   : > { %1521 = dma.done.wait (%p1958_p7), %s184_s22, 8192  }
  0x57   : > { %1523 = vsyncadd (%p1958_p7), %s184_s22, 4294959104  ;;  %p1959_p13 = scmp.ne.s32.totalorder %s1947_s17, 0 }
  0x59   : > { %1525 = dma.done.wait (%p1959_p13), [#allocation6], 2048  }
  0x5a   : > { %1527 = vsyncadd (%p1959_p13), [#allocation6], 4294965248  ;;  %v411_v0 = vld [vmem:[#allocation5] sm:$0xff]  ;;  %v412_v1 = vld [vmem:[#allocation5 + $0x8] sm:$0xff]  ;;  %s1818_s17 = scalar_lea.vmem [#allocation7], %s1066_s27  ;;  %s1075_s19 = sshll.u32 %s1546_s12, 13 }
  0x5b   : > { %v413_v2 = vld [vmem:[#allocation5 + $0x10] sm:$0xff]  ;;  %v1284_v3 = vpack.c.bf16 %v412_v1, %v411_v0  ;;  %v414_v4 = vld [vmem:[#allocation5 + $0x18] sm:$0xff]  ;;  %v415_v6 = vld [vmem:[#allocation5 + $0x20] sm:$0xff]  ;;  %s955_s21 = sshll.u32 %s1818_s17, 4  ;;  %s1885_s4 = scalar_lea.hbm %s1942_s2, %s1075_s19  ;;  %s1887_s21 = int_to_ptr.vmem [resolvable:$true] %s955_s21 }
  0x5c   : > { %v1288_v5 = vpack.c.bf16 %v414_v4, %v413_v2  ;;  %v416_v7 = vld [vmem:[#allocation5 + $0x28] sm:$0xff]  ;;  %v347_v9 = vld [vmem:[%s1742_s8] sm:$0xff]  ;;  %v417_v11 = vld [vmem:[#allocation5 + $0x30] sm:$0xff]  ;;  %s941_s12 = scalar_lea.sflag [#allocation4], %s1736_s16  ;;  %s1468_s5 = scalar_lea.vmem %s1887_s21, 8192 }
  0x5d   : > { %1285 = vmatprep.subr.bf16.mxu0 %v1284_v3  ;;  %1316 = vmatprep.subr.bf16.mxu1 %v1284_v3  ;;  %v1292_v8 = vpack.c.bf16 %v416_v7, %v415_v6  ;;  %v379_v10 = vld [vmem:[%s1742_s8 + $0x100] sm:$0xff]  ;;  %v418_v12 = vld [vmem:[#allocation5 + $0x38] sm:$0xff]  ;;  %v420_v15 = vld [vmem:[#allocation5 + $0x48] sm:$0xff]  ;;  %p1469_p4 = scmp.ne.s32.totalorder %s1887_s21, %s1468_s5  ;;  %s1560_s15 = smov [#allocation7]  }
  0x5e   : > { %1287 = vmatpush3.bf16.msra.mxu0 %v1284_v3  ;;  %1324 = vmatpush3.bf16.msra.mxu1 %v1284_v3  ;;  %v1296_v13 = vpack.c.bf16 %v418_v12, %v417_v11  ;;  %v419_v14 = vld [vmem:[#allocation5 + $0x40] sm:$0xff]  ;;  %v421_v17 = vld [vmem:[#allocation5 + $0x50] sm:$0xff]  ;;  %v422_v18 = vld [vmem:[#allocation5 + $0x58] sm:$0xff]  ;;  %s1472_s29 = sshll.u32 %s1560_s15, 4  ;;  %s1473_s29 = int_to_ptr.vmem [resolvable:$false] %s1472_s29 }
  0x5f   : > { %1289 = vmatprep.subr.bf16.mxu0 %v1288_v5  ;;  %1317 = vmatprep.subr.bf16.mxu1 %v1288_v5  ;;  %v1300_v16 = vpack.c.bf16 %v420_v15, %v419_v14  ;;  %v1304_v19 = vpack.c.bf16 %v422_v18, %v421_v17  ;;  %v423_v20 = vld [vmem:[#allocation5 + $0x60] sm:$0xff]  ;;  %v424_v21 = vld [vmem:[#allocation5 + $0x68] sm:$0xff]  ;;  %v425_v23 = vld [vmem:[#allocation5 + $0x70] sm:$0xff]  ;;  %p1470_p6 = pnand %p1469_p4, %p1677_p10  ;;  %s1474_s30 = scalar_lea.vmem %s1473_s29, 16384 }
  0x60   : > { %1188 = vmatprep.mubr.f32.mxu0 %v347_v9  ;;  %1236 = vmatprep.mubr.f32.mxu1 %v379_v10  ;;  %v1308_v22 = vpack.c.bf16 %v424_v21, %v423_v20  ;;  %v426_v24 = vld [vmem:[#allocation5 + $0x78] sm:$0xff]  ;;  %v348_v26 = vld [vmem:[%s1742_s8 + $0x8] sm:$0xff]  ;;  %v349_v28 = vld [vmem:[%s1742_s8 + $0x10] sm:$0xff]  ;;  %p1475_p12 = scmp.lt.s32.totalorder %s1887_s21, %s1473_s29  ;;  %p1476_p11 = scmp.lt.s32.totalorder %s1474_s30, %s1468_s5 }
  0x61   : > { %v1312_v25 = vpack.c.bf16 %v426_v24, %v425_v23  ;;  %v380_v27 = vld [vmem:[%s1742_s8 + $0x108] sm:$0xff]  ;;  %v381_v29 = vld [vmem:[%s1742_s8 + $0x110] sm:$0xff]  ;;  %v350_v30 = vld [vmem:[%s1742_s8 + $0x18] sm:$0xff]  ;;  %p1471_p8 = pneg %p1470_p6 }
  0x62   : > { %1291 = vmatpush3.bf16.msra.mxu0 %v1288_v5  ;;  %1325 = vmatpush3.bf16.msra.mxu1 %v1288_v5  ;;  %v382_v31 = vld [vmem:[%s1742_s8 + $0x118] sm:$0xff]  ;;  %v351_v32 = vld [vmem:[%s1742_s8 + $0x20] sm:$0xff]  ;;  %v352_v34 = vld [vmem:[%s1742_s8 + $0x28] sm:$0xff]  ;;  %p1477_p0 = por %p1476_p11, %p1475_p12 }
  0x63   : > { %1293 = vmatprep.subr.bf16.mxu0 %v1292_v8  ;;  %1318 = vmatprep.subr.bf16.mxu1 %v1292_v8  ;;  %v383_v33 = vld [vmem:[%s1742_s8 + $0x120] sm:$0xff]  ;;  %v384_v35 = vld [vmem:[%s1742_s8 + $0x128] sm:$0xff]  ;;  %v353_v36 = vld [vmem:[%s1742_s8 + $0x30] sm:$0xff] }
  0x64   : > { %v385_v37 = vld [vmem:[%s1742_s8 + $0x130] sm:$0xff]  ;;  %v354_v38 = vld [vmem:[%s1742_s8 + $0x38] sm:$0xff]  ;;  %v355_v40 = vld [vmem:[%s1742_s8 + $0x40] sm:$0xff]  ;;  %p1478_p5 = pnand %p1477_p0, %p1471_p8 }
  0x65   : > { %v386_v39 = vld [vmem:[%s1742_s8 + $0x138] sm:$0xff]  ;;  %v387_v41 = vld [vmem:[%s1742_s8 + $0x140] sm:$0xff]  ;;  %v356_v42 = vld [vmem:[%s1742_s8 + $0x48] sm:$0xff] }
  0x66   : > { %1295 = vmatpush3.bf16.msra.mxu0 %v1292_v8  ;;  %1326 = vmatpush3.bf16.msra.mxu1 %v1292_v8  ;;  %v388_v43 = vld [vmem:[%s1742_s8 + $0x148] sm:$0xff]  ;;  %v357_v44 = vld [vmem:[%s1742_s8 + $0x50] sm:$0xff]  ;;  %v358_v46 = vld [vmem:[%s1742_s8 + $0x58] sm:$0xff] }
  0x67   : > { %1297 = vmatprep.subr.bf16.mxu0 %v1296_v13  ;;  %1319 = vmatprep.subr.bf16.mxu1 %v1296_v13  ;;  %v389_v45 = vld [vmem:[%s1742_s8 + $0x150] sm:$0xff]  ;;  %v390_v47 = vld [vmem:[%s1742_s8 + $0x158] sm:$0xff]  ;;  %v359_v48 = vld [vmem:[%s1742_s8 + $0x60] sm:$0xff] }
  0x68   : > { %v391_v49 = vld [vmem:[%s1742_s8 + $0x160] sm:$0xff]  ;;  %v360_v50 = vld [vmem:[%s1742_s8 + $0x68] sm:$0xff]  ;;  %v361_v52 = vld [vmem:[%s1742_s8 + $0x70] sm:$0xff] }
  0x69   : > { %v392_v51 = vld [vmem:[%s1742_s8 + $0x168] sm:$0xff]  ;;  %v393_v53 = vld [vmem:[%s1742_s8 + $0x170] sm:$0xff]  ;;  %v362_v54 = vld [vmem:[%s1742_s8 + $0x78] sm:$0xff] }
  0x6a   : > { %1299 = vmatpush3.bf16.msra.mxu0 %v1296_v13  ;;  %1327 = vmatpush3.bf16.msra.mxu1 %v1296_v13  ;;  %v394_v55 = vld [vmem:[%s1742_s8 + $0x178] sm:$0xff]  ;;  %v363_v56 = vld [vmem:[%s1742_s8 + $0x80] sm:$0xff]  ;;  %v364_v58 = vld [vmem:[%s1742_s8 + $0x88] sm:$0xff] }
  0x6b   : > { %1301 = vmatprep.subr.bf16.mxu0 %v1300_v16  ;;  %1320 = vmatprep.subr.bf16.mxu1 %v1300_v16  ;;  %v395_v57 = vld [vmem:[%s1742_s8 + $0x180] sm:$0xff]  ;;  %v396_v59 = vld [vmem:[%s1742_s8 + $0x188] sm:$0xff]  ;;  %v365_v60 = vld [vmem:[%s1742_s8 + $0x90] sm:$0xff] }
  0x6c   : > { %v397_v61 = vld [vmem:[%s1742_s8 + $0x190] sm:$0xff]  ;;  %v366_v62 = vld [vmem:[%s1742_s8 + $0x98] sm:$0xff]  ;;  %v367_v0 = vld [vmem:[%s1742_s8 + $0xa0] sm:$0xff] }
  0x6d   : > { %v398_v63 = vld [vmem:[%s1742_s8 + $0x198] sm:$0xff]  ;;  %v399_v1 = vld [vmem:[%s1742_s8 + $0x1a0] sm:$0xff]  ;;  %v368_v2 = vld [vmem:[%s1742_s8 + $0xa8] sm:$0xff] }
  0x6e   : > { %1303 = vmatpush3.bf16.msra.mxu0 %v1300_v16  ;;  %1328 = vmatpush3.bf16.msra.mxu1 %v1300_v16  ;;  %v400_v3 = vld [vmem:[%s1742_s8 + $0x1a8] sm:$0xff]  ;;  %v369_v4 = vld [vmem:[%s1742_s8 + $0xb0] sm:$0xff]  ;;  %v370_v6 = vld [vmem:[%s1742_s8 + $0xb8] sm:$0xff] }
  0x6f   : > { %1305 = vmatprep.subr.bf16.mxu0 %v1304_v19  ;;  %1321 = vmatprep.subr.bf16.mxu1 %v1304_v19  ;;  %v401_v5 = vld [vmem:[%s1742_s8 + $0x1b0] sm:$0xff]  ;;  %v402_v7 = vld [vmem:[%s1742_s8 + $0x1b8] sm:$0xff]  ;;  %v371_v8 = vld [vmem:[%s1742_s8 + $0xc0] sm:$0xff] }
  0x70   : > { %v403_v9 = vld [vmem:[%s1742_s8 + $0x1c0] sm:$0xff]  ;;  %v372_v10 = vld [vmem:[%s1742_s8 + $0xc8] sm:$0xff]  ;;  %v373_v12 = vld [vmem:[%s1742_s8 + $0xd0] sm:$0xff] }
  0x71   : > { %v404_v11 = vld [vmem:[%s1742_s8 + $0x1c8] sm:$0xff]  ;;  %v405_v13 = vld [vmem:[%s1742_s8 + $0x1d0] sm:$0xff]  ;;  %v374_v14 = vld [vmem:[%s1742_s8 + $0xd8] sm:$0xff] }
  0x72   : > { %1307 = vmatpush3.bf16.msra.mxu0 %v1304_v19  ;;  %1329 = vmatpush3.bf16.msra.mxu1 %v1304_v19  ;;  %v406_v15 = vld [vmem:[%s1742_s8 + $0x1d8] sm:$0xff]  ;;  %v375_v16 = vld [vmem:[%s1742_s8 + $0xe0] sm:$0xff]  ;;  %v376_v18 = vld [vmem:[%s1742_s8 + $0xe8] sm:$0xff] }
  0x73   : > { %1309 = vmatprep.subr.bf16.mxu0 %v1308_v22  ;;  %1322 = vmatprep.subr.bf16.mxu1 %v1308_v22  ;;  %v407_v17 = vld [vmem:[%s1742_s8 + $0x1e0] sm:$0xff]  ;;  %v408_v19 = vld [vmem:[%s1742_s8 + $0x1e8] sm:$0xff]  ;;  %v377_v20 = vld [vmem:[%s1742_s8 + $0xf0] sm:$0xff] }
  0x74   : > { %v409_v21 = vld [vmem:[%s1742_s8 + $0x1f0] sm:$0xff]  ;;  %v410_v23 = vld [vmem:[%s1742_s8 + $0x1f8] sm:$0xff] }
  0x76   : > { %1311 = vmatpush3.bf16.msra.mxu0 %v1308_v22  ;;  %1330 = vmatpush3.bf16.msra.mxu1 %v1308_v22  ;;  %v378_v22 = vld [vmem:[%s1742_s8 + $0xf8] sm:$0xff] }
  0x77   : > { %1313 = vmatprep.subr.bf16.mxu0 %v1312_v25  ;;  %1323 = vmatprep.subr.bf16.mxu1 %v1312_v25 }
  0x7a   : > { %1315 = vmatpush3.bf16.msra.mxu0 %v1312_v25  ;;  %1331 = vmatpush3.bf16.msra.mxu1 %v1312_v25 }
  0x7d   : > { %1189 = vmatmul.mubr.f32.vlgmr.msra.gmra.mrb[0].mxu0 %v348_v26  ;;  %1237 = vmatmul.mubr.f32.vlgmr.msra.gmra.mrb[0].mxu1 %v380_v27 }
  0x7e   : > { %1191 = vmatprep.mubr.f32.mxu0 %v349_v28  ;;  %1239 = vmatprep.mubr.f32.mxu1 %v381_v29 }
  0x81   : > { %1192 = vmatmul.mubr.f32.gmra.mrb[2].mxu0 %v350_v30  ;;  %1240 = vmatmul.mubr.f32.gmra.mrb[2].mxu1 %v382_v31 }
  0x82   : > { %1194 = vmatprep.mubr.f32.mxu0 %v351_v32  ;;  %1242 = vmatprep.mubr.f32.mxu1 %v383_v33 }
  0x85   : > { %1195 = vmatmul.mubr.f32.gmra.mrb[4].mxu0 %v352_v34  ;;  %1243 = vmatmul.mubr.f32.gmra.mrb[4].mxu1 %v384_v35 }
  0x86   : > { %1197 = vmatprep.mubr.f32.mxu0 %v353_v36  ;;  %1245 = vmatprep.mubr.f32.mxu1 %v385_v37 }
  0x89   : > { %1198 = vmatmul.mubr.f32.gmra.mrb[6].mxu0 %v354_v38  ;;  %1246 = vmatmul.mubr.f32.gmra.mrb[6].mxu1 %v386_v39 }
  0x8a   : > { %1200 = vmatprep.mubr.f32.mxu0 %v355_v40  ;;  %1248 = vmatprep.mubr.f32.mxu1 %v387_v41 }
  0x8d   : > { %1201 = vmatmul.mubr.f32.gmra.mrb[8].mxu0 %v356_v42  ;;  %1249 = vmatmul.mubr.f32.gmra.mrb[8].mxu1 %v388_v43 }
  0x8e   : > { %1203 = vmatprep.mubr.f32.mxu0 %v357_v44  ;;  %1251 = vmatprep.mubr.f32.mxu1 %v389_v45 }
  0x91   : > { %1204 = vmatmul.mubr.f32.gmra.mrb[10].mxu0 %v358_v46  ;;  %1252 = vmatmul.mubr.f32.gmra.mrb[10].mxu1 %v390_v47 }
  0x92   : > { %1206 = vmatprep.mubr.f32.mxu0 %v359_v48  ;;  %1254 = vmatprep.mubr.f32.mxu1 %v391_v49 }
  0x95   : > { %1207 = vmatmul.mubr.f32.gmra.mrb[12].mxu0 %v360_v50  ;;  %1255 = vmatmul.mubr.f32.gmra.mrb[12].mxu1 %v392_v51 }
  0x96   : > { %1209 = vmatprep.mubr.f32.mxu0 %v361_v52  ;;  %1257 = vmatprep.mubr.f32.mxu1 %v393_v53 }
  0x99   : > { %1210 = vmatmul.mubr.f32.gmra.mrb[14].mxu0 %v362_v54  ;;  %1258 = vmatmul.mubr.f32.gmra.mrb[14].mxu1 %v394_v55 }
  0x9a   : > { %1212 = vmatprep.mubr.f32.mxu0 %v363_v56  ;;  %1260 = vmatprep.mubr.f32.mxu1 %v395_v57 }
  0x9d   : > { %1213 = vmatmul.mubr.f32.gmra.mrb[16].mxu0 %v364_v58  ;;  %1261 = vmatmul.mubr.f32.gmra.mrb[16].mxu1 %v396_v59 }
  0x9e   : > { %1215 = vmatprep.mubr.f32.mxu0 %v365_v60  ;;  %1263 = vmatprep.mubr.f32.mxu1 %v397_v61 }
  0xa1   : > { %1216 = vmatmul.mubr.f32.gmra.mrb[18].mxu0 %v366_v62  ;;  %1264 = vmatmul.mubr.f32.gmra.mrb[18].mxu1 %v398_v63 }
  0xa2   : > { %1218 = vmatprep.mubr.f32.mxu0 %v367_v0  ;;  %1266 = vmatprep.mubr.f32.mxu1 %v399_v1 }
  0xa5   : > { %1219 = vmatmul.mubr.f32.gmra.mrb[20].mxu0 %v368_v2  ;;  %1267 = vmatmul.mubr.f32.gmra.mrb[20].mxu1 %v400_v3 }
  0xa6   : > { %1221 = vmatprep.mubr.f32.mxu0 %v369_v4  ;;  %1269 = vmatprep.mubr.f32.mxu1 %v401_v5 }
  0xa9   : > { %1222 = vmatmul.mubr.f32.gmra.mrb[22].mxu0 %v370_v6  ;;  %1270 = vmatmul.mubr.f32.gmra.mrb[22].mxu1 %v402_v7 }
  0xaa   : > { %1224 = vmatprep.mubr.f32.mxu0 %v371_v8  ;;  %1272 = vmatprep.mubr.f32.mxu1 %v403_v9 }
  0xad   : > { %1225 = vmatmul.mubr.f32.gmra.mrb[24].mxu0 %v372_v10  ;;  %1273 = vmatmul.mubr.f32.gmra.mrb[24].mxu1 %v404_v11 }
  0xae   : > { %1227 = vmatprep.mubr.f32.mxu0 %v373_v12  ;;  %1275 = vmatprep.mubr.f32.mxu1 %v405_v13 }
  0xb1   : > { %1228 = vmatmul.mubr.f32.gmra.mrb[26].mxu0 %v374_v14  ;;  %1276 = vmatmul.mubr.f32.gmra.mrb[26].mxu1 %v406_v15 }
  0xb2   : > { %1230 = vmatprep.mubr.f32.mxu0 %v375_v16  ;;  %1278 = vmatprep.mubr.f32.mxu1 %v407_v17 }
  0xb5   : > { %1231 = vmatmul.mubr.f32.gmra.mrb[28].mxu0 %v376_v18  ;;  %1279 = vmatmul.mubr.f32.gmra.mrb[28].mxu1 %v408_v19 }
  0xb6   : > { %1233 = vmatprep.mubr.f32.mxu0 %v377_v20  ;;  %1281 = vmatprep.mubr.f32.mxu1 %v409_v21 }
  0xb9   : > { %1234 = vmatmul.mubr.f32.gmra.mrb[30].mxu0 %v378_v22  ;;  %1282 = vmatmul.mubr.f32.gmra.mrb[30].mxu1 %v410_v23 }
 0x150   : > { %v1190_v24 = vpop.f32.mrb[0].mxu0  ;;  %v1238_v25 = vpop.f32.mrb[0].mxu1 }
 0x151   : > { %v493_v26 = vpop.f32.mrb[1].mxu0  ;;  %v653_v27 = vpop.f32.mrb[1].mxu1  ;;  %877 = vst [vmem:[%s1818_s17 + $0x8] sm:$0xff] %v1190_v24  ;;  %909 = vst [vmem:[%s1818_s17 + $0x108] sm:$0xff] %v1238_v25 }
 0x152   : > { %876 = vst [vmem:[%s1818_s17] sm:$0xff] %v493_v26  ;;  %908 = vst [vmem:[%s1818_s17 + $0x100] sm:$0xff] %v653_v27 }
 0x154   : > { %v1193_v28 = vpop.f32.mrb[2].mxu0  ;;  %v1241_v29 = vpop.f32.mrb[2].mxu1 }
 0x155   : > { %v503_v30 = vpop.f32.mrb[3].mxu0  ;;  %v663_v31 = vpop.f32.mrb[3].mxu1  ;;  %879 = vst [vmem:[%s1818_s17 + $0x18] sm:$0xff] %v1193_v28  ;;  %911 = vst [vmem:[%s1818_s17 + $0x118] sm:$0xff] %v1241_v29 }
 0x156   : > { %878 = vst [vmem:[%s1818_s17 + $0x10] sm:$0xff] %v503_v30  ;;  %910 = vst [vmem:[%s1818_s17 + $0x110] sm:$0xff] %v663_v31 }
 0x158   : > { %v1196_v32 = vpop.f32.mrb[4].mxu0  ;;  %v1244_v33 = vpop.f32.mrb[4].mxu1 }
 0x159   : > { %v513_v34 = vpop.f32.mrb[5].mxu0  ;;  %v673_v35 = vpop.f32.mrb[5].mxu1  ;;  %881 = vst [vmem:[%s1818_s17 + $0x28] sm:$0xff] %v1196_v32  ;;  %913 = vst [vmem:[%s1818_s17 + $0x128] sm:$0xff] %v1244_v33 }
 0x15a   : > { %880 = vst [vmem:[%s1818_s17 + $0x20] sm:$0xff] %v513_v34  ;;  %912 = vst [vmem:[%s1818_s17 + $0x120] sm:$0xff] %v673_v35 }
 0x15c   : > { %v1199_v36 = vpop.f32.mrb[6].mxu0  ;;  %v1247_v37 = vpop.f32.mrb[6].mxu1 }
 0x15d   : > { %v523_v38 = vpop.f32.mrb[7].mxu0  ;;  %v683_v39 = vpop.f32.mrb[7].mxu1  ;;  %883 = vst [vmem:[%s1818_s17 + $0x38] sm:$0xff] %v1199_v36  ;;  %915 = vst [vmem:[%s1818_s17 + $0x138] sm:$0xff] %v1247_v37 }
 0x15e   : > { %882 = vst [vmem:[%s1818_s17 + $0x30] sm:$0xff] %v523_v38  ;;  %914 = vst [vmem:[%s1818_s17 + $0x130] sm:$0xff] %v683_v39 }
 0x160   : > { %v1202_v40 = vpop.f32.mrb[8].mxu0  ;;  %v1250_v41 = vpop.f32.mrb[8].mxu1 }
 0x161   : > { %v533_v42 = vpop.f32.mrb[9].mxu0  ;;  %v693_v43 = vpop.f32.mrb[9].mxu1  ;;  %885 = vst [vmem:[%s1818_s17 + $0x48] sm:$0xff] %v1202_v40  ;;  %917 = vst [vmem:[%s1818_s17 + $0x148] sm:$0xff] %v1250_v41 }
 0x162   : > { %884 = vst [vmem:[%s1818_s17 + $0x40] sm:$0xff] %v533_v42  ;;  %916 = vst [vmem:[%s1818_s17 + $0x140] sm:$0xff] %v693_v43 }
 0x164   : > { %v1205_v44 = vpop.f32.mrb[10].mxu0  ;;  %v1253_v45 = vpop.f32.mrb[10].mxu1 }
 0x165   : > { %v543_v46 = vpop.f32.mrb[11].mxu0  ;;  %v703_v47 = vpop.f32.mrb[11].mxu1  ;;  %887 = vst [vmem:[%s1818_s17 + $0x58] sm:$0xff] %v1205_v44  ;;  %919 = vst [vmem:[%s1818_s17 + $0x158] sm:$0xff] %v1253_v45 }
 0x166   : > { %886 = vst [vmem:[%s1818_s17 + $0x50] sm:$0xff] %v543_v46  ;;  %918 = vst [vmem:[%s1818_s17 + $0x150] sm:$0xff] %v703_v47 }
 0x168   : > { %v1208_v48 = vpop.f32.mrb[12].mxu0  ;;  %v1256_v49 = vpop.f32.mrb[12].mxu1 }
 0x169   : > { %v553_v50 = vpop.f32.mrb[13].mxu0  ;;  %v713_v51 = vpop.f32.mrb[13].mxu1  ;;  %889 = vst [vmem:[%s1818_s17 + $0x68] sm:$0xff] %v1208_v48  ;;  %921 = vst [vmem:[%s1818_s17 + $0x168] sm:$0xff] %v1256_v49 }
 0x16a   : > { %888 = vst [vmem:[%s1818_s17 + $0x60] sm:$0xff] %v553_v50  ;;  %920 = vst [vmem:[%s1818_s17 + $0x160] sm:$0xff] %v713_v51 }
 0x16c   : > { %v1211_v52 = vpop.f32.mrb[14].mxu0  ;;  %v1259_v53 = vpop.f32.mrb[14].mxu1 }
 0x16d   : > { %v563_v54 = vpop.f32.mrb[15].mxu0  ;;  %v723_v55 = vpop.f32.mrb[15].mxu1  ;;  %891 = vst [vmem:[%s1818_s17 + $0x78] sm:$0xff] %v1211_v52  ;;  %923 = vst [vmem:[%s1818_s17 + $0x178] sm:$0xff] %v1259_v53 }
 0x16e   : > { %890 = vst [vmem:[%s1818_s17 + $0x70] sm:$0xff] %v563_v54  ;;  %922 = vst [vmem:[%s1818_s17 + $0x170] sm:$0xff] %v723_v55 }
 0x170   : > { %v1214_v56 = vpop.f32.mrb[16].mxu0  ;;  %v1262_v57 = vpop.f32.mrb[16].mxu1 }
 0x171   : > { %v573_v58 = vpop.f32.mrb[17].mxu0  ;;  %v733_v59 = vpop.f32.mrb[17].mxu1  ;;  %893 = vst [vmem:[%s1818_s17 + $0x88] sm:$0xff] %v1214_v56  ;;  %925 = vst [vmem:[%s1818_s17 + $0x188] sm:$0xff] %v1262_v57 }
 0x172   : > { %892 = vst [vmem:[%s1818_s17 + $0x80] sm:$0xff] %v573_v58  ;;  %924 = vst [vmem:[%s1818_s17 + $0x180] sm:$0xff] %v733_v59 }
 0x174   : > { %v1217_v60 = vpop.f32.mrb[18].mxu0  ;;  %v1265_v61 = vpop.f32.mrb[18].mxu1 }
 0x175   : > { %v583_v62 = vpop.f32.mrb[19].mxu0  ;;  %v743_v63 = vpop.f32.mrb[19].mxu1  ;;  %895 = vst [vmem:[%s1818_s17 + $0x98] sm:$0xff] %v1217_v60  ;;  %927 = vst [vmem:[%s1818_s17 + $0x198] sm:$0xff] %v1265_v61 }
 0x176   : > { %894 = vst [vmem:[%s1818_s17 + $0x90] sm:$0xff] %v583_v62  ;;  %926 = vst [vmem:[%s1818_s17 + $0x190] sm:$0xff] %v743_v63 }
 0x178   : > { %v1220_v0 = vpop.f32.mrb[20].mxu0  ;;  %v1268_v1 = vpop.f32.mrb[20].mxu1 }
 0x179   : > { %v593_v2 = vpop.f32.mrb[21].mxu0  ;;  %v753_v3 = vpop.f32.mrb[21].mxu1  ;;  %897 = vst [vmem:[%s1818_s17 + $0xa8] sm:$0xff] %v1220_v0  ;;  %929 = vst [vmem:[%s1818_s17 + $0x1a8] sm:$0xff] %v1268_v1 }
 0x17a   : > { %896 = vst [vmem:[%s1818_s17 + $0xa0] sm:$0xff] %v593_v2  ;;  %928 = vst [vmem:[%s1818_s17 + $0x1a0] sm:$0xff] %v753_v3 }
 0x17c   : > { %v1223_v4 = vpop.f32.mrb[22].mxu0  ;;  %v1271_v5 = vpop.f32.mrb[22].mxu1 }
 0x17d   : > { %v603_v6 = vpop.f32.mrb[23].mxu0  ;;  %v763_v7 = vpop.f32.mrb[23].mxu1  ;;  %899 = vst [vmem:[%s1818_s17 + $0xb8] sm:$0xff] %v1223_v4  ;;  %931 = vst [vmem:[%s1818_s17 + $0x1b8] sm:$0xff] %v1271_v5 }
 0x17e   : > { %898 = vst [vmem:[%s1818_s17 + $0xb0] sm:$0xff] %v603_v6  ;;  %930 = vst [vmem:[%s1818_s17 + $0x1b0] sm:$0xff] %v763_v7 }
 0x180   : > { %v1226_v8 = vpop.f32.mrb[24].mxu0  ;;  %v1274_v9 = vpop.f32.mrb[24].mxu1 }
 0x181   : > { %v613_v10 = vpop.f32.mrb[25].mxu0  ;;  %v773_v11 = vpop.f32.mrb[25].mxu1  ;;  %901 = vst [vmem:[%s1818_s17 + $0xc8] sm:$0xff] %v1226_v8  ;;  %933 = vst [vmem:[%s1818_s17 + $0x1c8] sm:$0xff] %v1274_v9 }
 0x182   : > { %900 = vst [vmem:[%s1818_s17 + $0xc0] sm:$0xff] %v613_v10  ;;  %932 = vst [vmem:[%s1818_s17 + $0x1c0] sm:$0xff] %v773_v11 }
 0x184   : > { %v1229_v12 = vpop.f32.mrb[26].mxu0  ;;  %v1277_v13 = vpop.f32.mrb[26].mxu1 }
 0x185   : > { %v623_v14 = vpop.f32.mrb[27].mxu0  ;;  %v783_v15 = vpop.f32.mrb[27].mxu1  ;;  %903 = vst [vmem:[%s1818_s17 + $0xd8] sm:$0xff] %v1229_v12  ;;  %935 = vst [vmem:[%s1818_s17 + $0x1d8] sm:$0xff] %v1277_v13 }
 0x186   : > { %902 = vst [vmem:[%s1818_s17 + $0xd0] sm:$0xff] %v623_v14  ;;  %934 = vst [vmem:[%s1818_s17 + $0x1d0] sm:$0xff] %v783_v15 }
 0x188   : > { %v1232_v16 = vpop.f32.mrb[28].mxu0  ;;  %v1280_v17 = vpop.f32.mrb[28].mxu1 }
 0x189   : > { %v633_v18 = vpop.f32.mrb[29].mxu0  ;;  %v793_v19 = vpop.f32.mrb[29].mxu1  ;;  %905 = vst [vmem:[%s1818_s17 + $0xe8] sm:$0xff] %v1232_v16  ;;  %937 = vst [vmem:[%s1818_s17 + $0x1e8] sm:$0xff] %v1280_v17 }
 0x18a   : > { %904 = vst [vmem:[%s1818_s17 + $0xe0] sm:$0xff] %v633_v18  ;;  %936 = vst [vmem:[%s1818_s17 + $0x1e0] sm:$0xff] %v793_v19 }
 0x18c   : > { %v1235_v20 = vpop.f32.mrb[30].mxu0  ;;  %v1283_v21 = vpop.f32.mrb[30].mxu1 }
 0x18d   : > { %v643_v22 = vpop.f32.mrb[31].mxu0  ;;  %v803_v23 = vpop.f32.mrb[31].mxu1  ;;  %907 = vst [vmem:[%s1818_s17 + $0xf8] sm:$0xff] %v1235_v20  ;;  %939 = vst [vmem:[%s1818_s17 + $0x1f8] sm:$0xff] %v1283_v21 }
 0x18e   : > { %906 = vst [vmem:[%s1818_s17 + $0xf0] sm:$0xff] %v643_v22  ;;  %938 = vst [vmem:[%s1818_s17 + $0x1f0] sm:$0xff] %v803_v23 }
 0x18f   : > { %1481 = shalt.err (!%p1478_p5)
}
 0x190   : > { %s1482_s23 = scalar_lea.hbm %s1885_s4, 8192  ;;  %s1486_s26 = scalar_lea.hbm %s1942_s2, 16384 }
 0x191   : > { %p1483_p9 = scmp.ne.s32.totalorder %s1885_s4, %s1482_s23  ;;  %p1487_p3 = scmp.lt.u32.totalorder %s1885_s4, %s1942_s2 }
 0x192   : > { %p1488_p7 = scmp.lt.u32.totalorder %s1486_s26, %s1482_s23  ;;  %p1490_p4 = scmp.lt.u32.totalorder %s1482_s23, %s1885_s4 }
 0x193   : > { %p1484_p1 = pnand %p1483_p9, %p1677_p10 }
 0x194   : > { %p1489_p13 = por %p1488_p7, %p1487_p3 }
 0x195   : > { %p1485_p2 = pneg %p1484_p1 }
 0x196   : > { %p1491_p6 = por %p1490_p4, %p1489_p13 }
 0x198   : > { %p1492_p8 = pnand %p1491_p6, %p1485_p2 }
 0x19a   : > { %1495 = shalt.err (!%p1492_p8)
}
 0x19b   : > { %s1561_s8 = smov 128   ;;  %s1562_s17 = smov 8  }
 0x19c   : > { %1338 = dma.vmem_to_hbm [thread:$0]  (%p1677_p10), %s1887_s21, 8192, %s1885_s4, %s941_s12, %s1561_s8, %s1561_s8, %s1562_s17  }
 0x19d PF: > { %s970_s19 = sand.u32 1, %s1534_s9   ;;  %p1960_p12 = scmp.ne.s32.totalorder %s1950_s20, 0 }
 0x19e   : > { %p1961_p11 = scmp.ge.s32.totalorder %s1554_s14, 2  ;;  %s971_s6 = scalar_lea.sflag [#allocation4], %s970_s19 }
 0x1a0   : > { %p1349_p0 = pnand %p1961_p11, %p1960_p12 }
 0x1a2   : > { %1529 = dma.done.wait (!%p1349_p0), %s971_s6, 8192  }
 0x1a3   : > { %1531 = vsyncadd (!%p1349_p0), %s971_s6, 4294959104  ;;  %s19_s14 = sadd.s32 1, %s1554_s14   ;;  %s1962_s9 = smov %s1538_s10 }
 0x1a4   : > { %p16_p5 = scmp.ge.s32.totalorder %s19_s14, 4   ;;  %s1963_s10 = smov %s1542_s11 }
 0x1a5   : > { %s1964_s11 = smov %s1686_s28  ;;  %s1965_s12 = smov %s1550_s13 }
 0x1a6   : > { %s1966_s13 = smov %s1968_s25  ;;  %18 = sbr.rel (!%p16_p5) target bundleno = 7 (0x7), region = 82 }
 0x1ad   :  { %976 = vsyncpa [#allocation3], 1 }
 0x1ae   :  { %978 = vsyncpa [#allocation3 + $0x1], 1 }
 0x1af   :  { %979 = vsyncpa [#allocation6], 1 }
 0x1b0   :  { %980 = vsyncpa [#allocation4], 1 }
 0x1b1   :  { %982 = vsyncpa [#allocation4 + $0x1], 1 }

</bundles_post_ra>
